<compile_context>
chip_gen: v7x
topology: tpu7x:2x2x1
jax: 0.10.0
libtpu: 0.0.40
codegen_flags: <defaults>
</compile_context>

<pallas_src>
import jax
import jax.numpy as jnp
from jax.experimental import pallas as pl
from jax.experimental.pallas import tpu as pltpu

HIDDEN = 32    # small stand-in for hidden_size=256
VOCAB = 16     # small stand-in for output_size
MAX_LEN = 16   # small stand-in for max_length=100

SEG = 128      # one lane tile

# Column-group offsets inside the packed weight slab (each 128-lane aligned).
C_AX  = 0 * SEG   # x  -> attn logits      (width MAX_LEN)
C_CX  = 1 * SEG   # x  -> attn_combine     (width HIDDEN)
C_AH  = 2 * SEG   # h  -> attn logits      (width MAX_LEN)
C_GH  = 3 * SEG   # h  -> GRU gates        (width 4*HIDDEN: [r | z | 0 | n_h])
C_CA  = 4 * SEG   # attn_applied -> combine(width HIDDEN)
C_GI  = 5 * SEG   # g  -> GRU gates        (width 4*HIDDEN: [r | z | n_i | 0])
C_OUT = 6 * SEG   # h_new -> output logits (width VOCAB)
W_COLS = 7 * SEG

# Output slab lane offsets: [logp | h_new | attn_w | pad]  -> [1, 128]
O_LOGP, O_HID, O_ATTN = 0, VOCAB, VOCAB + HIDDEN
OUT_W = SEG


def attn_decoder_kernel(tok_ref, emb_hbm, h_ref, enc_ref, w_ref, b_ref,
                        out_ref, emb_buf, dma_sem):
    H, L, V = HIDDEN, MAX_LEN, VOCAB

    # ---- Start the embedding-row gather (one [1,H] row from the HBM table) and
    #      hide it behind all h-only work.
    tok = tok_ref[0]
    cp = pltpu.make_async_copy(emb_hbm.at[pl.ds(tok, 1), :], emb_buf, dma_sem)
    cp.start()

    h = h_ref[...]                                  # [1, H] f32
    hb = h.astype(jnp.bfloat16)

    # Single h-side matmul over two packed 128-lane groups:
    #   cols [C_AH, C_AH+SEG)  -> attention logits h-part
    #   cols [C_GH, C_GH+4H)   -> GRU h-side gates [r | z | 0 | n_h]
    hW = jnp.dot(hb, w_ref[:, C_AH:C_GH + 4 * H],
                 preferred_element_type=jnp.float32)          # [1, SEG + 4H] f32
    attn_h = hW[:, :L]
    h_gates = hW[:, SEG:SEG + 4 * H]                          # [1, 4H]

    # Bias rows (each starts at lane 0 of its own sublane row).
    b_attn = b_ref[0:1, 0:L]
    b_comb = b_ref[1:2, 0:H]
    b_gate = b_ref[2:3, 0:4 * H]
    b_out = b_ref[3:4, 0:V]

    # ---- Embedding row ready; eval-mode dropout is identity.
    cp.wait()
    x = emb_buf[...]                                # [1, H] f32
    xb = x.astype(jnp.bfloat16)

    # Single x-side matmul: attention x-part and combine x-part in one push.
    xW = jnp.dot(xb, w_ref[:, C_AX:C_CX + SEG],
                 preferred_element_type=jnp.float32)          # [1, 2*SEG] f32
    attn_x = xW[:, :L]
    comb_x = xW[:, SEG:SEG + H]

    # ---- Attention softmax over max_length (f32, EUP reciprocal).
    attn_logits = attn_x + attn_h + b_attn                    # [1, L]
    m = jnp.max(attn_logits, axis=-1, keepdims=True)
    e = jnp.exp(attn_logits - m)
    inv = pl.reciprocal(jnp.sum(e, axis=-1, keepdims=True), approx=True)
    attn_w = e * inv                                          # [1, L] f32

    # ---- attn_applied = attn_weights @ encoder_outputs.
    attn_applied = jnp.dot(attn_w.astype(jnp.bfloat16),
                           enc_ref[...].astype(jnp.bfloat16),
                           preferred_element_type=jnp.float32)  # [1, H] f32

    # ---- attn_combine + ReLU (split-K: x-part + attn_applied-part).
    comb_a = jnp.dot(attn_applied.astype(jnp.bfloat16), w_ref[:, C_CA:C_CA + SEG],
                     preferred_element_type=jnp.float32)[:, :H]
    g = jnp.maximum(comb_x + comb_a + b_comb, 0.0)            # [1, H] f32

    # ---- GRU cell, gates fused along N=4H: [r | z | n_i | n_h] (PyTorch order).
    gates = jnp.dot(g.astype(jnp.bfloat16), w_ref[:, C_GI:C_GI + SEG],
                    preferred_element_type=jnp.float32)[:, :4 * H] \
            + h_gates + b_gate                                # [1, 4H] f32
    r = jax.nn.sigmoid(gates[:, 0:H])
    z = jax.nn.sigmoid(gates[:, H:2 * H])
    n = jnp.tanh(gates[:, 2 * H:3 * H] + r * gates[:, 3 * H:4 * H])
    h_new = (1.0 - z) * n + z * h                             # [1, H] f32

    # ---- Output projection + log_softmax (f32).
    logits = jnp.dot(h_new.astype(jnp.bfloat16), w_ref[:, C_OUT:C_OUT + SEG],
                     preferred_element_type=jnp.float32)[:, :V] + b_out
    lm = jnp.max(logits, axis=-1, keepdims=True)
    sh = logits - lm
    logp = sh - jnp.log(jnp.sum(jnp.exp(sh), axis=-1, keepdims=True))

    # ---- One lane-dense [1,128] output slab: [logp | h_new | attn_w | pad].
    pad = jnp.zeros((1, OUT_W - (V + H + L)), jnp.float32)
    out_ref[...] = jnp.concatenate([logp, h_new, attn_w, pad], axis=1)


def attn_decoder_forward(token_id, hidden, encoder_outputs, params):
    """token_id: int32 scalar; hidden: [1,1,H]; encoder_outputs: [L,H].
    Returns (log_probs [1,V], hidden [1,1,H], attn_weights [1,L])."""
    H, L, V = HIDDEN, MAX_LEN, VOCAB
    tok = jnp.reshape(token_id, (1,)).astype(jnp.int32)
    h2d = jnp.reshape(hidden, (1, H)).astype(jnp.float32)
    enc = encoder_outputs.astype(jnp.float32)

    vmem = pl.BlockSpec(memory_space=pltpu.MemorySpace.VMEM)
    smem = pl.BlockSpec(memory_space=pltpu.MemorySpace.SMEM)
    anym = pl.BlockSpec(memory_space=pl.ANY)   # embedding table stays in HBM

    out = pl.pallas_call(
        attn_decoder_kernel,
        out_shape=jax.ShapeDtypeStruct((1, OUT_W), jnp.float32),
        in_specs=[smem, anym, vmem, vmem, vmem, vmem],
        out_specs=vmem,
        scratch_shapes=[pltpu.VMEM((1, H), jnp.float32),    # embedding-row buffer
                        pltpu.SemaphoreType.DMA(())],
        compiler_params=pltpu.CompilerParams(vmem_limit_bytes=4 * 1024 * 1024),
    )(tok, params["embedding"], h2d, enc, params["w_all"], params["bias"])

    logp = out[:, O_LOGP:O_LOGP + V]
    h_out = out[:, O_HID:O_HID + H].reshape(1, 1, H)
    attn_w = out[:, O_ATTN:O_ATTN + L]
    return logp, h_out, attn_w


def init_params(key, hidden, output_size, max_len):
    """Deterministic init mirroring the PyTorch module's layer shapes.  All
    H-contraction weights are packed (transposed) into one bf16 [H, 7*128] slab
    with 128-lane-aligned segments; all biases go into one [8,128] f32 slab."""
    H, V, L = hidden, output_size, max_len
    assert 4 * H <= SEG and L <= SEG and V <= SEG and V + H + L <= OUT_W
    ks = jax.random.split(key, 11)

    def lin_w(k, fan_in, fan_out):
        b = fan_in ** -0.5
        return jax.random.uniform(k, (fan_out, fan_in), jnp.float32, -b, b)

    def lin_b(k, fan_in, fan_out):
        b = fan_in ** -0.5
        return jax.random.uniform(k, (fan_out,), jnp.float32, -b, b)

    embedding = jax.random.normal(ks[0], (V, H), jnp.float32)     # nn.Embedding default
    w_attn = lin_w(ks[1], 2 * H, L)                               # attn: Linear(2H -> L)
    b_attn = lin_b(ks[2], 2 * H, L)
    w_comb = lin_w(ks[3], 2 * H, H)                               # attn_combine: Linear(2H -> H)
    b_comb = lin_b(ks[4], 2 * H, H)
    w_ih = lin_w(ks[5], H, 3 * H)                                 # GRU weight_ih_l0 [3H, H]
    w_hh = lin_w(ks[6], H, 3 * H)                                 # GRU weight_hh_l0 [3H, H]
    b_ih = lin_b(ks[7], H, 3 * H)
    b_hh = lin_b(ks[8], H, 3 * H)
    w_out = lin_w(ks[9], H, V)                                    # out: Linear(H -> V)
    b_out = lin_b(ks[10], H, V)

    # Packed weight slab (kernel computes act @ W_T slices).
    W = jnp.zeros((H, W_COLS), jnp.float32)
    W = W.at[:, C_AX:C_AX + L].set(w_attn.T[:H])                  # attn, x half
    W = W.at[:, C_AH:C_AH + L].set(w_attn.T[H:])                  # attn, h half
    W = W.at[:, C_CX:C_CX + H].set(w_comb.T[:H])                  # combine, x half
    W = W.at[:, C_CA:C_CA + H].set(w_comb.T[H:])                  # combine, attn half
    W = W.at[:, C_GI:C_GI + 2 * H].set(w_ih[:2 * H].T)            # i-side r, z
    W = W.at[:, C_GI + 2 * H:C_GI + 3 * H].set(w_ih[2 * H:].T)    # i-side n
    W = W.at[:, C_GH:C_GH + 2 * H].set(w_hh[:2 * H].T)            # h-side r, z
    W = W.at[:, C_GH + 3 * H:C_GH + 4 * H].set(w_hh[2 * H:].T)    # h-side n
    W = W.at[:, C_OUT:C_OUT + V].set(w_out.T)                     # output projection

    # Bias slab: one [8,128] vreg, one segment per sublane row (lane offset 0).
    B = jnp.zeros((8, SEG), jnp.float32)
    B = B.at[0, :L].set(b_attn)
    B = B.at[1, :H].set(b_comb)
    B = B.at[2, :2 * H].set(b_ih[:2 * H] + b_hh[:2 * H])          # r, z combined bias
    B = B.at[2, 2 * H:3 * H].set(b_ih[2 * H:])                    # n, i-side bias
    B = B.at[2, 3 * H:4 * H].set(b_hh[2 * H:])                    # n, h-side bias
    B = B.at[3, :V].set(b_out)

    return {
        "embedding": embedding,                 # [V, H] f32 (stays in HBM)
        "w_all": W.astype(jnp.bfloat16),        # [H, 7*128] bf16
        "bias": B,                              # [8, 128] f32
    }


def reference_forward(token_id, hidden, encoder_outputs, params):
    """Pure-JAX f32 reference of the same module math, built from the packed
    (bf16-quantized) weights so only MXU activation casts differ."""
    H, L, V = HIDDEN, MAX_LEN, VOCAB
    W = params["w_all"].astype(jnp.float32)
    b = params["bias"]
    x = params["embedding"][token_id].reshape(1, H)
    h = hidden.reshape(1, H)

    wa_x = W[:, C_AX:C_AX + L]
    wa_h = W[:, C_AH:C_AH + L]
    wc_x = W[:, C_CX:C_CX + H]
    wc_a = W[:, C_CA:C_CA + H]
    wgi = W[:, C_GI:C_GI + 4 * H]
    wgh = W[:, C_GH:C_GH + 4 * H]
    w_out = W[:, C_OUT:C_OUT + V]
    b_attn = b[0, :L]
    b_comb = b[1, :H]
    b_gate = b[2, :4 * H]
    b_out = b[3, :V]

    attn_w = jax.nn.softmax(x @ wa_x + h @ wa_h + b_attn, axis=-1)
    attn_applied = attn_w @ encoder_outputs
    g = jnp.maximum(x @ wc_x + attn_applied @ wc_a + b_comb, 0.0)
    gates = g @ wgi + h @ wgh + b_gate
    r = jax.nn.sigmoid(gates[:, :H])
    z = jax.nn.sigmoid(gates[:, H:2 * H])
    n = jnp.tanh(gates[:, 2 * H:3 * H] + r * gates[:, 3 * H:4 * H])
    h_new = (1.0 - z) * n + z * h
    logp = jax.nn.log_softmax(h_new @ w_out + b_out, axis=-1)
    return logp, h_new.reshape(1, 1, H), attn_w


if __name__ == "__main__":
    key = jax.random.PRNGKey(0)
    pkey, ekey, hkey = jax.random.split(key, 3)
    params = init_params(pkey, HIDDEN, VOCAB, MAX_LEN)

    token_id = jnp.array(3, dtype=jnp.int32)                              # single input token
    hidden0 = 0.1 * jax.random.normal(hkey, (1, 1, HIDDEN), jnp.float32)  # decoder hidden state
    encoder_outputs = jax.random.normal(ekey, (MAX_LEN, HIDDEN), jnp.float32)

    logp, hidden, attn_w = attn_decoder_forward(token_id, hidden0, encoder_outputs, params)
    logp = jax.block_until_ready(logp)
    hidden = jax.block_until_ready(hidden)
    attn_w = jax.block_until_ready(attn_w)

    ref_logp, ref_hidden, ref_attn = reference_forward(token_id, hidden0, encoder_outputs, params)

    assert logp.shape == (1, VOCAB)
    assert hidden.shape == (1, 1, HIDDEN)
    assert attn_w.shape == (1, MAX_LEN)
    # Tolerance loosened for bf16 MXU-operand casts and the approx EUP reciprocal.
    assert jnp.allclose(logp, ref_logp, atol=2e-2, rtol=2e-2)
    assert jnp.allclose(hidden, ref_hidden, atol=2e-2, rtol=2e-2)
    assert jnp.allclose(attn_w, ref_attn, atol=2e-2, rtol=2e-2)

    print("KERNEL_OK")
</pallas_src>

<mosaic_0001>
module attributes {stable_mosaic.version = 11 : i64} {
  func.func @attn_decoder_kernel(%arg0: memref<1xi32, #tpu.memory_space<smem>>, %arg1: memref<16x32xf32, #tpu.memory_space<any>>, %arg2: memref<1x32xf32, #tpu.memory_space<vmem>>, %arg3: memref<16x32xf32, #tpu.memory_space<vmem>>, %arg4: memref<32x896xbf16, #tpu.memory_space<vmem>>, %arg5: memref<8x128xf32, #tpu.memory_space<vmem>>, %arg6: memref<1x128xf32, #tpu.memory_space<vmem>>, %arg7: memref<1x32xf32, #tpu.memory_space<vmem>>, %arg8: memref<!tpu.dma_semaphore, #tpu.memory_space<semaphore_mem>>) attributes {dimension_semantics = [], scalar_prefetch = 0 : i64, scratch_operands = 2 : i64, tpu.core_type = #tpu.core_type<tc>} {
    %c0 = arith.constant 0 : index
    %0 = memref.load %arg0[%c0] : memref<1xi32, #tpu.memory_space<smem>>
    %c0_i32 = arith.constant 0 : i32
    %1 = tpu.memref_slice %arg1[%0, %c0_i32] : memref<16x32xf32, #tpu.memory_space<any>> -> memref<1x32xf32, #tpu.memory_space<any>>
    tpu.enqueue_dma source(%1 : memref<1x32xf32, #tpu.memory_space<any>>) target(%arg7 : memref<1x32xf32, #tpu.memory_space<vmem>>) target_semaphore(%arg8 : memref<!tpu.dma_semaphore, #tpu.memory_space<semaphore_mem>>)
    %c0_0 = arith.constant 0 : index
    %c0_1 = arith.constant 0 : index
    %2 = vector.load %arg2[%c0_0, %c0_1] : memref<1x32xf32, #tpu.memory_space<vmem>>, vector<1x32xf32>
    %3 = arith.truncf %2 : vector<1x32xf32> to vector<1x32xbf16>
    %c0_2 = arith.constant 0 : index
    %c256 = arith.constant 256 : index
    %4 = vector.load %arg4[%c0_2, %c256] : memref<32x896xbf16, #tpu.memory_space<vmem>>, vector<32x256xbf16>
    %cst = arith.constant dense<0.000000e+00> : vector<1x256xf32>
    %5 = tpu.matmul %3, %4, %cst {dimension_numbers = #tpu.dot_dimension_numbers<[1], [0], [0], [1], [0, 0, 1, 1], [], []>} : vector<1x32xbf16>, vector<32x256xbf16>, vector<1x256xf32> -> vector<1x256xf32>
    %6 = vector.extract_strided_slice %5 {offsets = [0, 0], sizes = [1, 16], strides = [1, 1]} : vector<1x256xf32> to vector<1x16xf32>
    %7 = vector.extract_strided_slice %5 {offsets = [0, 128], sizes = [1, 128], strides = [1, 1]} : vector<1x256xf32> to vector<1x128xf32>
    %c0_3 = arith.constant 0 : index
    %c0_4 = arith.constant 0 : index
    %8 = vector.load %arg5[%c0_3, %c0_4] : memref<8x128xf32, #tpu.memory_space<vmem>>, vector<1x16xf32>
    %c1 = arith.constant 1 : index
    %c0_5 = arith.constant 0 : index
    %9 = vector.load %arg5[%c1, %c0_5] : memref<8x128xf32, #tpu.memory_space<vmem>>, vector<1x32xf32>
    %c2 = arith.constant 2 : index
    %c0_6 = arith.constant 0 : index
    %10 = vector.load %arg5[%c2, %c0_6] : memref<8x128xf32, #tpu.memory_space<vmem>>, vector<1x128xf32>
    %c3 = arith.constant 3 : index
    %c0_7 = arith.constant 0 : index
    %11 = vector.load %arg5[%c3, %c0_7] : memref<8x128xf32, #tpu.memory_space<vmem>>, vector<1x16xf32>
    %c0_i32_8 = arith.constant 0 : i32
    %12 = tpu.memref_slice %arg1[%0, %c0_i32_8] : memref<16x32xf32, #tpu.memory_space<any>> -> memref<1x32xf32, #tpu.memory_space<any>>
    tpu.wait_dma2 semaphore(%arg8 : memref<!tpu.dma_semaphore, #tpu.memory_space<semaphore_mem>>) src(%12 : memref<1x32xf32, #tpu.memory_space<any>>) dst(%arg7 : memref<1x32xf32, #tpu.memory_space<vmem>>)
    %c0_9 = arith.constant 0 : index
    %c0_10 = arith.constant 0 : index
    %13 = vector.load %arg7[%c0_9, %c0_10] : memref<1x32xf32, #tpu.memory_space<vmem>>, vector<1x32xf32>
    %14 = arith.truncf %13 : vector<1x32xf32> to vector<1x32xbf16>
    %c0_11 = arith.constant 0 : index
    %c0_12 = arith.constant 0 : index
    %15 = vector.load %arg4[%c0_11, %c0_12] : memref<32x896xbf16, #tpu.memory_space<vmem>>, vector<32x256xbf16>
    %cst_13 = arith.constant dense<0.000000e+00> : vector<1x256xf32>
    %16 = tpu.matmul %14, %15, %cst_13 {dimension_numbers = #tpu.dot_dimension_numbers<[1], [0], [0], [1], [0, 0, 1, 1], [], []>} : vector<1x32xbf16>, vector<32x256xbf16>, vector<1x256xf32> -> vector<1x256xf32>
    %17 = vector.extract_strided_slice %16 {offsets = [0, 0], sizes = [1, 16], strides = [1, 1]} : vector<1x256xf32> to vector<1x16xf32>
    %18 = vector.extract_strided_slice %16 {offsets = [0, 128], sizes = [1, 32], strides = [1, 1]} : vector<1x256xf32> to vector<1x32xf32>
    %19 = arith.addf %17, %6 : vector<1x16xf32>
    %20 = arith.addf %19, %8 : vector<1x16xf32>
    %cst_14 = arith.constant dense<0xFF800000> : vector<1xf32>
    %21 = vector.multi_reduction <maximumf>, %20, %cst_14 [1] : vector<1x16xf32> to vector<1xf32>
    %22 = vector.shape_cast %21 : vector<1xf32> to vector<1x1xf32>
    %23 = vector.broadcast %22 : vector<1x1xf32> to vector<1x16xf32>
    %24 = arith.subf %20, %23 : vector<1x16xf32>
    %25 = math.exp %24 : vector<1x16xf32>
    %cst_15 = arith.constant dense<0.000000e+00> : vector<1xf32>
    %26 = vector.multi_reduction <add>, %25, %cst_15 [1] : vector<1x16xf32> to vector<1xf32>
    %27 = vector.shape_cast %26 : vector<1xf32> to vector<1x1xf32>
    %28 = tpu.reciprocal %27 {approx = true} : vector<1x1xf32> -> vector<1x1xf32>
    %29 = vector.broadcast %28 : vector<1x1xf32> to vector<1x16xf32>
    %30 = arith.mulf %25, %29 : vector<1x16xf32>
    %31 = arith.truncf %30 : vector<1x16xf32> to vector<1x16xbf16>
    %c0_16 = arith.constant 0 : index
    %c0_17 = arith.constant 0 : index
    %32 = vector.load %arg3[%c0_16, %c0_17] : memref<16x32xf32, #tpu.memory_space<vmem>>, vector<16x32xf32>
    %33 = arith.truncf %32 : vector<16x32xf32> to vector<16x32xbf16>
    %cst_18 = arith.constant dense<0.000000e+00> : vector<1x32xf32>
    %34 = tpu.matmul %31, %33, %cst_18 {dimension_numbers = #tpu.dot_dimension_numbers<[1], [0], [0], [1], [0, 0, 1, 1], [], []>} : vector<1x16xbf16>, vector<16x32xbf16>, vector<1x32xf32> -> vector<1x32xf32>
    %35 = arith.truncf %34 : vector<1x32xf32> to vector<1x32xbf16>
    %c0_19 = arith.constant 0 : index
    %c512 = arith.constant 512 : index
    %36 = vector.load %arg4[%c0_19, %c512] : memref<32x896xbf16, #tpu.memory_space<vmem>>, vector<32x128xbf16>
    %cst_20 = arith.constant dense<0.000000e+00> : vector<1x128xf32>
    %37 = tpu.matmul %35, %36, %cst_20 {dimension_numbers = #tpu.dot_dimension_numbers<[1], [0], [0], [1], [0, 0, 1, 1], [], []>} : vector<1x32xbf16>, vector<32x128xbf16>, vector<1x128xf32> -> vector<1x128xf32>
    %38 = vector.extract_strided_slice %37 {offsets = [0, 0], sizes = [1, 32], strides = [1, 1]} : vector<1x128xf32> to vector<1x32xf32>
    %39 = arith.addf %18, %38 : vector<1x32xf32>
    %40 = arith.addf %39, %9 : vector<1x32xf32>
    %cst_21 = arith.constant 0.000000e+00 : f32
    %41 = vector.broadcast %cst_21 : f32 to vector<1x32xf32>
    %42 = arith.maximumf %40, %41 : vector<1x32xf32>
    %43 = arith.truncf %42 : vector<1x32xf32> to vector<1x32xbf16>
    %c0_22 = arith.constant 0 : index
    %c640 = arith.constant 640 : index
    %44 = vector.load %arg4[%c0_22, %c640] : memref<32x896xbf16, #tpu.memory_space<vmem>>, vector<32x128xbf16>
    %cst_23 = arith.constant dense<0.000000e+00> : vector<1x128xf32>
    %45 = tpu.matmul %43, %44, %cst_23 {dimension_numbers = #tpu.dot_dimension_numbers<[1], [0], [0], [1], [0, 0, 1, 1], [], []>} : vector<1x32xbf16>, vector<32x128xbf16>, vector<1x128xf32> -> vector<1x128xf32>
    %46 = arith.addf %45, %7 : vector<1x128xf32>
    %47 = arith.addf %46, %10 : vector<1x128xf32>
    %48 = vector.extract_strided_slice %47 {offsets = [0, 0], sizes = [1, 32], strides = [1, 1]} : vector<1x128xf32> to vector<1x32xf32>
    %49 = arith.negf %48 : vector<1x32xf32>
    %50 = math.exp %49 : vector<1x32xf32>
    %cst_24 = arith.constant 1.000000e+00 : f32
    %51 = vector.broadcast %cst_24 : f32 to vector<1x32xf32>
    %52 = arith.addf %51, %50 : vector<1x32xf32>
    %53 = arith.divf %51, %52 : vector<1x32xf32>
    %54 = vector.extract_strided_slice %47 {offsets = [0, 32], sizes = [1, 32], strides = [1, 1]} : vector<1x128xf32> to vector<1x32xf32>
    %55 = arith.negf %54 : vector<1x32xf32>
    %56 = math.exp %55 : vector<1x32xf32>
    %cst_25 = arith.constant 1.000000e+00 : f32
    %57 = vector.broadcast %cst_25 : f32 to vector<1x32xf32>
    %58 = arith.addf %57, %56 : vector<1x32xf32>
    %59 = arith.divf %57, %58 : vector<1x32xf32>
    %60 = vector.extract_strided_slice %47 {offsets = [0, 64], sizes = [1, 32], strides = [1, 1]} : vector<1x128xf32> to vector<1x32xf32>
    %61 = vector.extract_strided_slice %47 {offsets = [0, 96], sizes = [1, 32], strides = [1, 1]} : vector<1x128xf32> to vector<1x32xf32>
    %62 = arith.mulf %53, %61 : vector<1x32xf32>
    %63 = arith.addf %60, %62 : vector<1x32xf32>
    %64 = math.tanh %63 : vector<1x32xf32>
    %cst_26 = arith.constant 1.000000e+00 : f32
    %65 = vector.broadcast %cst_26 : f32 to vector<1x32xf32>
    %66 = arith.subf %65, %59 : vector<1x32xf32>
    %67 = arith.mulf %66, %64 : vector<1x32xf32>
    %68 = arith.mulf %59, %2 : vector<1x32xf32>
    %69 = arith.addf %67, %68 : vector<1x32xf32>
    %70 = arith.truncf %69 : vector<1x32xf32> to vector<1x32xbf16>
    %c0_27 = arith.constant 0 : index
    %c768 = arith.constant 768 : index
    %71 = vector.load %arg4[%c0_27, %c768] : memref<32x896xbf16, #tpu.memory_space<vmem>>, vector<32x128xbf16>
    %cst_28 = arith.constant dense<0.000000e+00> : vector<1x128xf32>
    %72 = tpu.matmul %70, %71, %cst_28 {dimension_numbers = #tpu.dot_dimension_numbers<[1], [0], [0], [1], [0, 0, 1, 1], [], []>} : vector<1x32xbf16>, vector<32x128xbf16>, vector<1x128xf32> -> vector<1x128xf32>
    %73 = vector.extract_strided_slice %72 {offsets = [0, 0], sizes = [1, 16], strides = [1, 1]} : vector<1x128xf32> to vector<1x16xf32>
    %74 = arith.addf %73, %11 : vector<1x16xf32>
    %cst_29 = arith.constant dense<0xFF800000> : vector<1xf32>
    %75 = vector.multi_reduction <maximumf>, %74, %cst_29 [1] : vector<1x16xf32> to vector<1xf32>
    %76 = vector.shape_cast %75 : vector<1xf32> to vector<1x1xf32>
    %77 = vector.broadcast %76 : vector<1x1xf32> to vector<1x16xf32>
    %78 = arith.subf %74, %77 : vector<1x16xf32>
    %79 = math.exp %78 : vector<1x16xf32>
    %cst_30 = arith.constant dense<0.000000e+00> : vector<1xf32>
    %80 = vector.multi_reduction <add>, %79, %cst_30 [1] : vector<1x16xf32> to vector<1xf32>
    %81 = vector.shape_cast %80 : vector<1xf32> to vector<1x1xf32>
    %82 = math.log %81 : vector<1x1xf32>
    %83 = vector.broadcast %82 : vector<1x1xf32> to vector<1x16xf32>
    %84 = arith.subf %78, %83 : vector<1x16xf32>
    %cst_31 = arith.constant 0.000000e+00 : f32
    %85 = vector.broadcast %cst_31 : f32 to vector<1x64xf32>
    %86 = tpu.concatenate %84, %69, %30, %85 in 1 : vector<1x16xf32>, vector<1x32xf32>, vector<1x16xf32>, vector<1x64xf32> -> vector<1x128xf32>
    %c0_32 = arith.constant 0 : index
    %c0_33 = arith.constant 0 : index
    %87 = vector.load %arg6[%c0_32, %c0_33] : memref<1x128xf32, #tpu.memory_space<vmem>>, vector<1x128xf32>
    tpu.vector_store %arg6[%c0_32, %c0_33], %86 {strides = array<i32>} : memref<1x128xf32, #tpu.memory_space<vmem>>, vector<1x128xf32>,
    return
  }
}

</mosaic_0001>

<bundles_post_ra>
// kernel: tpu_custom_call.1
= control target key start
LH: loop header
LB: loop body
LE: loop exit
PB: predicated region body
PF: predicated region fallthrough
CT: control target
= control target key end

     0   :  { %12 = vsyncpa [#allocation6], 0  ;;  %s919_s0 = inlined_call_operand.<no memory space> [shape: s32[1], index: 0, kind: input, shape index: {}]   ;;  %s920_s1 = inlined_call_operand.hbm [shape: f32[16,32], index: 1, kind: input, shape index: {}]   ;;  %s921_s2 = inlined_call_operand.vmem [shape: f32[1,32], index: 2, kind: input, shape index: {}]   ;;  %s922_s3 = inlined_call_operand.hbm [shape: f32[16,32], index: 3, kind: input, shape index: {}]   ;;  %s923_s4 = inlined_call_operand.hbm [shape: bf16[32,896], index: 4, kind: input, shape index: {}]   ;;  %s924_s5 = inlined_call_operand.vmem [shape: f32[8,128], index: 5, kind: input, shape index: {}]   ;;  %s925_s6 = inlined_call_operand.hbm [shape: f32[1,128], index: 6, kind: output, shape index: {}]  }
   0x1   :  { %13 = vsyncpa [#allocation9], 0 }
   0x2   :  { %14 = vsyncpa [#allocation7], 0  ;;  %s757_s21 = smov [#allocation5]   ;;  %s659_s25 = scalar_lea.hbm %s922_s3, 256 }
   0x3   :  { %s24_s22 = sshll.u32 %s757_s21, 4  ;;  %p660_p0 = scmp.ne.s32.totalorder %s922_s3, %s659_s25  ;;  %s25_s22 = int_to_ptr.vmem [resolvable:$true] %s24_s22 }
   0x4   :  { %p663_p1 = scmp.lt.u32.totalorder %s659_s25, %s922_s3 }
   0x6   :  { %p665_p2 = pnand %p663_p1, %p660_p0 }
   0x8   :  { %668 = shalt.err (!%p665_p2)
}
   0x9   :  { %s669_s30 = scalar_lea.vmem %s25_s22, 256  ;;  %p674_p4 = scmp.lt.s32.totalorder %s25_s22, %s25_s22 }
   0xa   :  { %p670_p3 = scmp.ne.s32.totalorder %s25_s22, %s669_s30  ;;  %p675_p5 = scmp.lt.s32.totalorder %s669_s30, %s669_s30 }
   0xc   :  { %p676_p6 = por %p675_p5, %p674_p4 }
   0xe   :  { %p677_p7 = pnand %p676_p6, %p670_p3 }
  0x10   :  { %680 = shalt.err (!%p677_p7)
}
  0x11   :  { %s758_s7 = smov 128   ;;  %s759_s8 = smov 8  }
  0x12   :  { %30 = dma.hbm_to_vmem [thread:$0]  %s922_s3, 256, %s25_s22, [#allocation6], %s758_s7, %s758_s7, %s759_s8  }
  0x13   :  { %s760_s11 = smov [#allocation8]   ;;  %s681_s15 = scalar_lea.hbm %s923_s4, 1792 }
  0x14   :  { %s36_s12 = sshll.u32 %s760_s11, 4  ;;  %p682_p8 = scmp.ne.s32.totalorder %s923_s4, %s681_s15  ;;  %s37_s12 = int_to_ptr.vmem [resolvable:$true] %s36_s12 }
  0x15   :  { %p685_p9 = scmp.lt.u32.totalorder %s681_s15, %s923_s4 }
  0x17   :  { %p687_p10 = pnand %p685_p9, %p682_p8 }
  0x19   :  { %690 = shalt.err (!%p687_p10)
}
  0x1a   :  { %s691_s20 = scalar_lea.vmem %s37_s12, 1792  ;;  %p696_p12 = scmp.lt.s32.totalorder %s37_s12, %s37_s12 }
  0x1b   :  { %p692_p11 = scmp.ne.s32.totalorder %s37_s12, %s691_s20  ;;  %p697_p13 = scmp.lt.s32.totalorder %s691_s20, %s691_s20 }
  0x1d   :  { %p698_p0 = por %p697_p13, %p696_p12 }
  0x1f   :  { %p699_p1 = pnand %p698_p0, %p692_p11 }
  0x21   :  { %702 = shalt.err (!%p699_p1)
}
  0x22   :  { %s761_s3 = smov 448   ;;  %s762_s21 = smov 28  }
  0x23   :  { %42 = dma.hbm_to_vmem [thread:$0]  %s923_s4, 1792, %s37_s12, [#allocation9], %s761_s3, %s761_s3, %s762_s21  }
  0x24   :  { %749 = dma.done.wait [#allocation6], 256  }
  0x25   :  { %750 = vsyncadd [#allocation6], 4294967040 }
  0x26   :  { %751 = dma.done.wait [#allocation9], 1792  }
  0x27   :  { %752 = vsyncadd [#allocation9], 4294965504  ;;  %v763_v0 = vmov 0   ;;  %v137_v1 = vld [vmem:[%s924_s5] sm:$0x1]  ;;  %vm92_vm0 = vcmask 261120  }
  0x28   :  { %128 = vmatprep.mubr.bf16.mxu0 %v763_v0  ;;  %v838_v2 = vld [vmem:[%s924_s5 + $0x1] sm:$0x1]  ;;  %v843_v3 = vld [vmem:[%s924_s5 + $0x2] sm:$0x1]  ;;  %v848_v4 = vld [vmem:[%s924_s5 + $0x3] sm:$0x1] }
  0x29   :  { %v627_v5 = vld [vmem:[#allocation8 + $0xc] ss:$28 sps:$4 sm:$0xff]   ;;  %v630_v7 = vld [vmem:[#allocation8 + $0x44] ss:$28 sps:$4 sm:$0xff]   ;;  %s547_s10 = sshll.u32 %s919_s0, 4  ;;  %s764_s11 = smov [#allocation2]  }
  0x2a   :  { %v629_v6 = vld [vmem:[#allocation8 + $0x8] ss:$28 sps:$4 sm:$0xff]   ;;  %96 = vmatprep.subr.bf16.mxu0 %v627_v5  ;;  %v632_v8 = vld [vmem:[#allocation8 + $0x40] ss:$28 sps:$4 sm:$0xff]   ;;  %v853_v9 = vld [vmem:[%s921_s2] sm:$0x1]  ;;  %s54_s15 = scalar_lea.hbm %s920_s1, %s547_s10 }
  0x2b   :  { %97 = vmatpush1.bf16.msra.mxu0 %v629_v6  ;;  %v67_v10 = vpack.c.bf16 %v853_v9, %v853_v9  ;;  %s62_s12 = sshll.u32 %s764_s11, 4  ;;  %s703_s2 = scalar_lea.hbm %s54_s15, 16  ;;  %s63_s12 = int_to_ptr.vmem [resolvable:$true] %s62_s12 }
  0x2c   :  { %98 = vmatprep.subr.bf16.mxu0 %v630_v7  ;;  %p704_p2 = scmp.ne.s32.totalorder %s54_s15, %s703_s2  ;;  %s705_s18 = scalar_lea.hbm %s920_s1, 256 }
  0x2d   :  { %p706_p3 = scmp.lt.u32.totalorder %s54_s15, %s920_s1  ;;  %p707_p4 = scmp.lt.u32.totalorder %s705_s18, %s703_s2 }
  0x2e   :  { %p709_p6 = scmp.lt.u32.totalorder %s703_s2, %s54_s15 }
  0x2f   :  { %99 = vmatpush1.bf16.msra.mxu0 %v632_v8  ;;  %p708_p5 = por %p707_p4, %p706_p3 }
  0x31   :  { %p710_p7 = por %p709_p6, %p708_p5 }
  0x32   :  { %552 = vmatmul.mubr.msk.bf16.vlgmr.msra.gmra.mrb[0].mxu0 %vm92_vm0, %v67_v10 }
  0x33   :  { %p711_p8 = pnand %p710_p7, %p704_p2 }
  0x35   :  { %714 = shalt.err (!%p711_p8)  }
  0x36   :  { %s715_s0 = scalar_lea.vmem %s63_s12, 16  ;;  %p720_p10 = scmp.lt.s32.totalorder %s63_s12, %s63_s12 }
  0x37   :  { %p716_p9 = scmp.ne.s32.totalorder %s63_s12, %s715_s0  ;;  %p721_p11 = scmp.lt.s32.totalorder %s715_s0, %s715_s0 }
  0x39   :  { %p722_p12 = por %p721_p11, %p720_p10 }
  0x3b   :  { %p723_p13 = pnand %p722_p12, %p716_p9 }
  0x3d   :  { %726 = shalt.err (!%p723_p13)  }
  0x3e   :  { %65 = dma.hbm_to_vmem [thread:$0]  %s54_s15, 16, %s63_s12, [#allocation3] }
 0x105   :  { %v130_v11 = vpop.f32.mrb[0].mxu0 }
 0x106   :  { %v870_v12 = vpop.f32.mrb[1].mxu0 }
 0x107   :  { %v134_v13 = vpop.f32.mrb[2].mxu0 }
 0x108   :  { %v135_v14 = vpop.f32.mrb[3].mxu0 }
 0x109   :  { %753 = dma.done.wait [#allocation3], 16 }
 0x10a   :  { %754 = vsyncadd [#allocation3], 4294967280  ;;  %205 = vmatprep.mubr.bf16.mxu1 %v763_v0  ;;  %v633_v15 = vld [vmem:[#allocation8 + $0x4] ss:$28 sps:$4 sm:$0xff]   ;;  %v636_v17 = vld [vmem:[#allocation8 + $0x3c] ss:$28 sps:$4 sm:$0xff]  }
 0x10b   :  { %v635_v16 = vld [vmem:[#allocation8] ss:$28 sps:$4 sm:$0xff]   ;;  %173 = vmatprep.subr.bf16.mxu1 %v633_v15  ;;  %v638_v18 = vld [vmem:[#allocation8 + $0x38] ss:$28 sps:$4 sm:$0xff]   ;;  %v144_v19 = vld [vmem:[#allocation2] sm:$0x1] }
 0x10c   :  { %174 = vmatpush1.bf16.msra.mxu1 %v635_v16  ;;  %v145_v20 = vpack.c.bf16 %v144_v19, %v144_v19  ;;  %vm216_vm1 = vcmask 122880   ;;  %v229_v33 = vld [vmem:[#allocation5] sm:$0xff]  ;;  %v230_v34 = vld [vmem:[#allocation5 + $0x8] sm:$0xff]  ;;  %v765_v35 = vmov 0.0   ;;  %vm766_vm2 = vmmov 0   ;;  %s767_s1 = smov 32  }
 0x10d   :  { %175 = vmatprep.subr.bf16.mxu1 %v636_v17  ;;  %581 = vmatprep.subr.bf16.mxu0 %v765_v35  ;;  %v231_v36 = vpack.c.bf16 %v230_v34, %v229_v33  ;;  %v639_v37 = vld [vmem:[#allocation8 + $0x10] ss:$28 sps:$4 sm:$0xff]   ;;  %v640_v38 = vld [vmem:[#allocation8 + $0x48] ss:$28 sps:$4 sm:$0xff]   ;;  %vm232_vm3 = vcmask 130048   ;;  %s768_s3 = smov 64  }
 0x10e   :  { %583 = vmatprep.mubr.msk.bf16.mxu0 %vm766_vm2, %v765_v35  ;;  %v641_v48 = vld [vmem:[#allocation8 + $0x14] ss:$28 sps:$4 sm:$0xff]   ;;  %v642_v49 = vld [vmem:[#allocation8 + $0x4c] ss:$28 sps:$4 sm:$0xff]   ;;  %s769_s21 = smov 96   ;;  %s770_s22 = smov 112  }
 0x10f   :  { %582 = vmatpush3.bf16.msra.mxu0 %v231_v36  ;;  %v643_v14 = vld [vmem:[#allocation8 + $0x18] ss:$28 sps:$4 sm:$0xff]   ;;  %v644_v15 = vld [vmem:[#allocation8 + $0x50] ss:$28 sps:$4 sm:$0xff]   ;;  %s771_s23 = smov 48   ;;  %vm518_vm4 = vcmask 392192  }
 0x110   :  { %176 = vmatpush1.bf16.msra.mxu1 %v638_v18  ;;  %595 = vmatprep.subr.bf16.mxu0 %v765_v35  ;;  %s772_s24 = smov [#allocation10]   ;;  %vm520_vm5 = vcmask 523264  }
 0x111   :  { %587 = vmatprep.subr.bf16.mxu1 %v765_v35  ;;  %s529_s25 = sshll.u32 %s772_s24, 4  ;;  %s530_s25 = int_to_ptr.vmem [resolvable:$true] %s529_s25 }
 0x112   :  { %s727_s26 = scalar_lea.vmem %s530_s25, 16  ;;  %s731_s27 = scalar_lea.vmem %s530_s25, 32 }
 0x113   :  { %557 = vmatmul.mubr.msk.bf16.vlgmr.msra.gmra.mrb[0].mxu1 %vm92_vm0, %v145_v20  ;;  %p728_p0 = scmp.ne.s32.totalorder %s530_s25, %s727_s26  ;;  %p732_p1 = scmp.lt.s32.totalorder %s530_s25, %s530_s25 }
 0x114   :  { %591 = vmatprep.mubr.msk.bf16.mxu1 %vm766_vm2, %v765_v35  ;;  %588 = vmatpush3.bf16.msra.mxu1 %v639_v37  ;;  %p733_p2 = scmp.lt.s32.totalorder %s731_s27, %s727_s26 }
 0x115   :  { %589 = vmatprep.subr.bf16.mxu1 %v765_v35 }
 0x116   :  { %p734_p3 = por %p733_p2, %p732_p1 }
 0x118   :  { %590 = vmatpush3.bf16.msra.mxu1 %v640_v38  ;;  %p735_p4 = pnand %p734_p3, %p728_p0 }
 0x119   :  { %603 = vmatprep.subr.bf16.mxu1 %v765_v35 }
 0x1e6   :  { %v207_v21 = vpop.f32.mrb[0].mxu1 }
 0x1e7   :  { %v214_v22 = vadd.f32 %v207_v21, %v130_v11  ;;  %v209_v23 = vpop.f32.mrb[1].mxu1 }
 0x1e8   :  { %v211_v24 = vpop.f32.mrb[2].mxu1 }
 0x1e9   :  { %v215_v25 = vadd.f32 %v214_v22, %v137_v1  ;;  %v212_v26 = vpop.f32.mrb[3].mxu1 }
 0x1eb   :  { %v217_v27 = vsel %vm216_vm1, %v215_v25, -inf }
 0x1ec   :  { %218 = vmax.xlane.f32.xlu0 %v217_v27 }
 0x279   :  { %v219_v28 = vpop.xlane.xlu0 %218 }
 0x27a   :  { %v220_v29 = vsub.f32 %v215_v25, %v219_v28 }
 0x27c   :  { %v221_v30 = vmul.f32 1.442695, %v220_v29 }
 0x27e   :  { %645 = vpow2.f32 %v221_v30 }
 0x288   :  { %v646_v31 = vpop.eup %645 }
 0x289   :  { %v223_v32 = vsel %vm216_vm1, %v646_v31, 0.0 }
 0x28a   :  { %224 = vadd.xlane.f32.xlu0 %v223_v32 }
 0x317   :  { %v225_v39 = vpop.xlane.xlu0 %224 }
 0x318   :  { %647 = vrcp.f32 %v225_v39 }
 0x322   :  { %v648_v40 = vpop.eup %647 }
 0x323   :  { %v884_v41 = vmul.f32 %v648_v40, %v646_v31 }
 0x325   :  { %v228_v42 = vpack.c.bf16 %v884_v41, %v884_v41 }
 0x327   :  { %584 = vmatmul.mubr.msk.bf16.vlgmr.msra.gmra.mrb[4].mxu0 %vm232_vm3, %v228_v42 }
 0x328   :  { %599 = vmatprep.mubr.msk.bf16.mxu0 %vm766_vm2, %v765_v35  ;;  %596 = vmatpush3.bf16.msra.mxu0 %v641_v48 }
 0x329   :  { %597 = vmatprep.subr.bf16.mxu0 %v765_v35 }
 0x32c   :  { %598 = vmatpush3.bf16.msra.mxu0 %v642_v49 }
 0x3fa   :  { %v270_v43 = vpop.f32.mrb[4].mxu0 }
 0x3fb   :  { %v276_v44 = vpack.c.bf16 %v270_v43, %v270_v43  ;;  %v585_v45 = vpop.f32.mrb[5].mxu0 }
 0x3fc   :  { %v273_v46 = vpop.f32.mrb[6].mxu0 }
 0x3fd   :  { %v586_v47 = vpop.f32.mrb[7].mxu0  ;;  %592 = vmatmul.mubr.msk.bf16.vlgmr.msra.gmra.mrb[4].mxu1 %vm92_vm0, %v276_v44 }
 0x3fe   :  { %607 = vmatprep.mubr.msk.bf16.mxu1 %vm766_vm2, %v765_v35  ;;  %604 = vmatpush3.bf16.msra.mxu1 %v643_v14 }
 0x3ff   :  { %605 = vmatprep.subr.bf16.mxu1 %v765_v35 }
 0x402   :  { %606 = vmatpush3.bf16.msra.mxu1 %v644_v15 }
 0x4d0   :  { %v330_v50 = vpop.f32.mrb[4].mxu1 }
 0x4d1   :  { %v336_v51 = vadd.f32 %v330_v50, %v209_v23  ;;  %v593_v52 = vpop.f32.mrb[5].mxu1 }
 0x4d2   :  { %v333_v53 = vpop.f32.mrb[6].mxu1 }
 0x4d3   :  { %v337_v54 = vadd.f32 %v336_v51, %v838_v2  ;;  %v594_v55 = vpop.f32.mrb[7].mxu1  ;;  %v424_v2 = vlaneseq }
 0x4d5   :  { %v338_v56 = vmax.f32 %v337_v54, 0.0  ;;  %v425_v6 = vshrl.u32 %v424_v2, 7 }
 0x4d7   :  { %v339_v57 = vpack.c.bf16 %v338_v56, %v338_v56  ;;  %v426_v7 = vsub.s32 0, %v425_v6 }
 0x4d9   :  { %600 = vmatmul.mubr.msk.bf16.vlgmr.msra.gmra.mrb[8].mxu0 %vm92_vm0, %v339_v57 }
 0x5ac   :  { %v393_v58 = vpop.f32.mrb[8].mxu0 }
 0x5ad   :  { %v394_v59 = vadd.f32 %v393_v58, %v870_v12  ;;  %v601_v60 = vpop.f32.mrb[9].mxu0  ;;  %v427_v12 = vrot.slane %v853_v9, %v426_v7 }
 0x5ae   :  { %v396_v61 = vpop.f32.mrb[10].mxu0 }
 0x5af   :  { %v399_v62 = vadd.f32 %v394_v59, %v843_v3  ;;  %v602_v63 = vpop.f32.mrb[11].mxu0 }
 0x5b1   :  { %407 = vrot.lane.b32.xlu1 %v399_v62, %s767_s1  ;;  %v565_v0 = vmul.f32 -1.442695, %v399_v62 }
 0x5b3   :  { %649 = vpow2.f32 %v565_v0 }
 0x5bd   :  { %v650_v1 = vpop.eup %649 }
 0x5be   :  { %v403_v5 = vadd.f32 1.0, %v650_v1 }
 0x5c0   :  { %651 = vrcp.f32 %v403_v5 }
 0x5ca   :  { %v652_v8 = vpop.eup %651 }
 0x5cb   :  { %v417_v18 = vsub.f32 1.0, %v652_v8 }
 0x623   :  { %v408_v10 = vpop.permute.xlu1 %407 }
 0x624   :  { %v410_v11 = vmul.f32 %v652_v8, %v408_v10 }
 0x626   :  { %412 = vrot.lane.b32.xlu1 %v410_v11, %s768_s3 }
 0x62a   :  { %428 = vrot.lane.b32.xlu1 %v427_v12, %s767_s1 }
 0x698   :  { %v413_v3 = vpop.permute.xlu1 %412 }
 0x699   :  { %v415_v13 = vadd.f32 %v413_v3, %v399_v62 }
 0x69b   :  { %653 = vtanh.f32 %v415_v13 }
 0x69c   :  { %v429_v17 = vpop.permute.xlu1 %428 }
 0x69d   :  { %v431_v20 = vmul.f32 %v652_v8, %v429_v17 }
 0x6a5   :  { %v654_v16 = vpop.eup %653 }
 0x6a6   :  { %419 = vrot.lane.b32.xlu0 %v654_v16, %s769_s21 }
 0x718   :  { %v420_v19 = vpop.permute.xlu0 %419 }
 0x719   :  { %v422_v21 = vmul.f32 %v420_v19, %v417_v18 }
 0x71b   :  { %v432_v22 = vadd.f32 %v431_v20, %v422_v21 }
 0x71d   :  { %v433_v9 = vpack.c.bf16 %v432_v22, %v432_v22 }
 0x71f   :  { %439 = vrot.lane.b32.xlu1 %v433_v9, %s769_s21 }
 0x791   :  { %v440_v23 = vpop.permute.xlu1 %439 }
 0x792   :  { %608 = vmatmul.mubr.msk.bf16.vlgmr.msra.gmra.mrb[8].mxu1 %vm92_vm0, %v440_v23 }
 0x865   :  { %v490_v24 = vpop.f32.mrb[8].mxu1 }
 0x866   :  { %v496_v25 = vadd.f32 %v490_v24, %v848_v4  ;;  %v609_v26 = vpop.f32.mrb[9].mxu1 }
 0x867   :  { %v493_v27 = vpop.f32.mrb[10].mxu1 }
 0x868   :  { %v610_v28 = vpop.f32.mrb[11].mxu1  ;;  %v497_v29 = vsel %vm216_vm1, %v496_v25, -inf }
 0x869   :  { %498 = vmax.xlane.f32.xlu1 %v497_v29 }
 0x87a   :  { %510 = vrot.lane.b32.xlu1 %v432_v22, %s770_s22 }
 0x8f6   :  { %v499_v30 = vpop.xlane.xlu1 %498 }
 0x8f7   :  { %v500_v31 = vsub.f32 %v496_v25, %v499_v30 }
 0x8f9   :  { %v501_v32 = vmul.f32 1.442695, %v500_v31 }
 0x8fa   :  { %v511_v38 = vpop.permute.xlu1 %510 }
 0x8fb   :  { %655 = vpow2.f32 %v501_v32 }
 0x905   :  { %v656_v33 = vpop.eup %655 }
 0x906   :  { %v503_v34 = vsel %vm216_vm1, %v656_v33, 0.0 }
 0x907   :  { %504 = vadd.xlane.f32.xlu0 %v503_v34 }
 0x91d   :  { %514 = vrot.lane.b32.xlu0 %v884_v41, %s771_s23 }
 0x994   :  { %v505_v4 = vpop.xlane.xlu0 %504 }
 0x995   :  { %657 = vlog2.f32 %v505_v4 }
 0x998   :  { %v515_v39 = vpop.permute.xlu0 %514 }
 0x99f   :  { %v658_v35 = vpop.eup %657 }
 0x9a0   :  { %v507_v36 = vmul.f32 0.6931472, %v658_v35 }
 0x9a2   :  { %v508_v37 = vsub.f32 %v500_v31, %v507_v36 }
 0x9a4   :  { %v517_v40 = vsel %vm232_vm3, %v508_v37, %v511_v38 }
 0x9a5   :  { %v519_v42 = vsel %vm518_vm4, %v517_v40, %v515_v39 }
 0x9a6   :  { %v521_v43 = vsel %vm520_vm5, %v519_v42, 0.0 }
 0x9a7   :  { %522 = vst [vmem:[#allocation10] sm:$0x1] %v521_v43 }
 0x9a8   :  { %738 = shalt.err (!%p735_p4)
}
 0x9a9   :  { %s739_s4 = scalar_lea.hbm %s925_s6, 16 }
 0x9aa   :  { %p740_p5 = scmp.ne.s32.totalorder %s925_s6, %s739_s4  ;;  %p743_p6 = scmp.lt.u32.totalorder %s739_s4, %s925_s6 }
 0x9ac   :  { %p745_p7 = pnand %p743_p6, %p740_p5 }
 0x9ae   :  { %748 = shalt.err (!%p745_p7)
}
 0x9af   :  { %532 = dma.vmem_to_hbm [thread:$0]  %s530_s25, 16, %s925_s6, [#allocation7]  }
 0x9b0   :  { %755 = dma.done.wait [#allocation7], 16  }
 0x9b1   :  { %756 = vsyncadd [#allocation7], 4294967280 }
 0x9b2   :  { %536 = vsyncpa [#allocation6], 1 }
 0x9b3   :  { %537 = vsyncpa [#allocation9], 1 }
 0x9b4   :  { %538 = vsyncpa [#allocation7], 1 }
 0x9b5   :  { %539 = vsyncmov [#allocation3] }
 0x9b8   :  { %s540_s11 = vpop.sfrf %539 }
 0x9b9   :  { %p569_p8 = scmp.ne.s32.totalorder %s540_s11, 0 }
 0x9bb   :  { %544 = shalt.err (%p569_p8)  }

</bundles_post_ra>
